<compile_context>
chip_gen: v7x
topology: tpu7x:2x2x1
jax: 0.10.0
libtpu: 0.0.40
codegen_flags: <defaults>
</compile_context>

<pallas_src>
import jax
import jax.numpy as jnp
from jax.experimental import pallas as pl
from jax.experimental.pallas import tpu as pltpu

_LANE = 128
_SUBLANE = 8
_V7X_SPLIT_MIN_B = 2048  # below this, duplicated weight DMA beats the 2-TC split


def _round_up(x, m):
    return ((x + m - 1) // m) * m


def _num_tensorcores_per_chip():
    try:
        kind = jax.devices()[0].device_kind.lower()
    except Exception:
        return 1
    return 2 if "v7" in kind else 1


def _vmem_limit_bytes(rows, d_in, h, a_pad, w_itemsize, *, pipelined):
    act = rows * (d_in + a_pad) * 4          # x tile + out tile (f32)
    hid = rows * h * 4                       # fc1 intermediate (f32)
    wgt = (d_in * h + h * a_pad) * w_itemsize + (h + a_pad) * 4
    bufs = 2 if pipelined else 1             # BlockSpec path double-buffers
    need = bufs * (act + wgt) + hid
    # Keep under v7x's 64 MiB physical VMEM with headroom; never below the
    # 32 MiB scoped default.
    return int(min(48 << 20, max(32 << 20, (need * 3) // 2)))


def _policy_kernel(x_ref, w1_ref, b1_ref, w2_ref, b2_ref, out_ref):
    # fc1: (B, D_in) @ (D_in, H), f32 MXU accumulation. Casting activations to
    # the weight dtype is a no-op for f32 and enables the bf16 MXU path when
    # weights are stored in bf16.
    h = jnp.dot(x_ref[...].astype(w1_ref.dtype), w1_ref[...],
                preferred_element_type=jnp.float32)
    # (B, H) + (1, H): sublane broadcast on the VPU; bias add + ReLU in f32.
    h = jnp.maximum(h + b1_ref[...], 0.0)
    # fc2: (B, H) @ (H, A_pad). A_pad is a multiple of 128 lanes, so the output
    # store is lane-dense (unmasked vst), not a masked partial store.
    o = jnp.dot(h.astype(w2_ref.dtype), w2_ref[...],
                preferred_element_type=jnp.float32)
    out_ref[...] = (o + b2_ref[...]).astype(out_ref.dtype)


def policy_forward(x, w1, b1, w2, b2, *, action_space, batch_tile=4096,
                   return_padded=False):
    """Fused Policy forward: relu(x @ w1 + b1) @ w2 + b2.

    x : (B, D_in) f32
    w1: (D_in, H)   f32 or bf16  (transpose of PyTorch fc1.weight)
    b1: (1, H)      f32
    w2: (H, A_pad)  f32 or bf16, zero-padded past `action_space`
    b2: (1, A_pad)  f32,         zero-padded past `action_space`
    Returns (B, action_space) logits, or the lane-dense (B, A_pad) slab if
    return_padded=True (valid first `action_space` columns, zeros after).
    """
    B, D_in = x.shape
    H = w1.shape[1]
    A_pad = w2.shape[1]
    A = action_space
    assert A_pad % _LANE == 0 and A <= A_pad, \
        "w2/b2 must be lane-padded (use init_policy_params/prepare_policy_params)"

    n_cores = _num_tensorcores_per_chip()

    # Generation-aware tiling: on v7x split large batches into exactly n_cores
    # "parallel" tiles so both TensorCores get work; on single-TC chips a grid
    # is a serial loop, so stay gridless whenever the batch fits VMEM.
    tb = None
    if n_cores > 1 and B > _V7X_SPLIT_MIN_B:
        tb = min(batch_tile, _round_up(-(-B // n_cores), _SUBLANE))
    elif B > batch_tile:
        tb = batch_tile

    if tb is None:
        # Gridless: every operand placed whole in VMEM, single kernel
        # invocation, no pipeline prologue/epilogue or double buffering.
        vmem = pl.BlockSpec(memory_space=pltpu.MemorySpace.VMEM)
        out_p = pl.pallas_call(
            _policy_kernel,
            out_shape=jax.ShapeDtypeStruct((B, A_pad), jnp.float32),
            in_specs=[vmem, vmem, vmem, vmem, vmem],
            out_specs=vmem,
            compiler_params=pltpu.CompilerParams(
                vmem_limit_bytes=_vmem_limit_bytes(
                    B, D_in, H, A_pad, w1.dtype.itemsize, pipelined=False)),
        )(x, w1, b1, w2, b2)
    else:
        # Batch-tiled ragged grid: no host-side padding of x; Pallas masks the
        # writes of the partial final block, and garbage rows in the padded
        # read region never reach HBM (rows are independent). Weights/biases
        # use constant index_maps so they are DMA'd once and stay
        # VMEM-resident across batch tiles.
        # (pipeline_mode=pl.Buffered(1) on the grid-invariant operands would
        #  also drop their second VMEM buffer; left at default for portability.)
        grid = (pl.cdiv(B, tb),)
        out_p = pl.pallas_call(
            _policy_kernel,
            out_shape=jax.ShapeDtypeStruct((B, A_pad), jnp.float32),
            grid=grid,
            in_specs=[
                pl.BlockSpec((tb, D_in), lambda i: (i, 0)),
                pl.BlockSpec((D_in, H), lambda i: (0, 0)),
                pl.BlockSpec((1, H), lambda i: (0, 0)),
                pl.BlockSpec((H, A_pad), lambda i: (0, 0)),
                pl.BlockSpec((1, A_pad), lambda i: (0, 0)),
            ],
            out_specs=pl.BlockSpec((tb, A_pad), lambda i: (i, 0)),
            compiler_params=pltpu.CompilerParams(
                dimension_semantics=("parallel",),  # v7x: both TCs split batch
                vmem_limit_bytes=_vmem_limit_bytes(
                    tb, D_in, H, A_pad, w1.dtype.itemsize, pipelined=True)),
        )(x, w1, b1, w2, b2)

    if return_padded:
        return out_p
    return out_p[:, :A]


def prepare_policy_params(w1, b1, w2, b2):
    """One-time layout prep: biases to (1, .) f32, w2/b2 zero-padded to a
    multiple of 128 lanes. Call once at init, not per forward."""
    H = w1.shape[1]
    A = w2.shape[1]
    A_pad = max(_LANE, _round_up(A, _LANE))
    b1p = jnp.reshape(b1, (1, H)).astype(jnp.float32)
    w2p = jnp.pad(w2, ((0, 0), (0, A_pad - A)))
    b2p = jnp.pad(jnp.reshape(b2, (1, A)).astype(jnp.float32),
                  ((0, 0), (0, A_pad - A)))
    return w1, b1p, w2p, b2p


def init_policy_params(key, input_dimension, action_space, hidden=512,
                       param_dtype=jnp.float32):
    """xavier_normal_ weights, zero biases (matches Policy.init_weights).
    Weights stored [in, out] (transpose of PyTorch); w2/b2 pre-padded to 128
    lanes so no per-call padding is needed."""
    d_in = input_dimension * 2
    k1, k2 = jax.random.split(key)

    def xavier_normal(k, fan_in, fan_out):
        std = (2.0 / (fan_in + fan_out)) ** 0.5
        w = std * jax.random.normal(k, (fan_in, fan_out), dtype=jnp.float32)
        return w.astype(param_dtype)

    w1 = xavier_normal(k1, d_in, hidden)
    b1 = jnp.zeros((hidden,), dtype=jnp.float32)
    w2 = xavier_normal(k2, hidden, action_space)
    b2 = jnp.zeros((action_space,), dtype=jnp.float32)
    return prepare_policy_params(w1, b1, w2, b2)


def _ref_forward(x, w1, b1, w2, b2):
    # Pure-JAX reference on the prepared (padded) params; returns (B, A_pad).
    h = jnp.maximum(x @ w1.astype(jnp.float32) + b1, 0.0)
    return h @ w2.astype(jnp.float32) + b2


if __name__ == "__main__":
    key = jax.random.PRNGKey(0)
    kx1, kx2, kp = jax.random.split(key, 3)

    # Small shapes: input_dimension=16 -> fc1 in_features=32, hidden=512,
    # action_space=6 (padded to 128 lanes inside init).
    batch = 8
    input_dimension = 16
    action_space = 6

    w1, b1, w2p, b2p = init_policy_params(kp, input_dimension, action_space)

    # 1) Small batch -> gridless, all-operands-in-VMEM path.
    x = jax.random.normal(kx1, (batch, input_dimension * 2), dtype=jnp.float32)
    logits = jax.block_until_ready(
        policy_forward(x, w1, b1, w2p, b2p, action_space=action_space))
    ref = _ref_forward(x, w1, b1, w2p, b2p)[:, :action_space]
    assert logits.shape == (batch, action_space)
    assert jnp.allclose(logits, ref, atol=1e-4, rtol=1e-4)

    # 2) Larger batch, forced onto the batch-tiled ragged-grid path
    #    (tile=64, B=300 -> 5 tiles, last one partial and write-masked).
    big_batch = 300
    xb = jax.random.normal(kx2, (big_batch, input_dimension * 2), dtype=jnp.float32)
    logits_b = jax.block_until_ready(
        policy_forward(xb, w1, b1, w2p, b2p, action_space=action_space,
                       batch_tile=64))
    ref_b = _ref_forward(xb, w1, b1, w2p, b2p)[:, :action_space]
    assert logits_b.shape == (big_batch, action_space)
    assert jnp.allclose(logits_b, ref_b, atol=1e-4, rtol=1e-4)

    # 3) Same batch via the default (gridless) path, keeping the lane-dense
    #    padded slab (no post-kernel slice); padded columns are exactly zero.
    logits_pad = jax.block_until_ready(
        policy_forward(xb, w1, b1, w2p, b2p, action_space=action_space,
                       return_padded=True))
    assert logits_pad.shape == (big_batch, _LANE)
    assert jnp.allclose(logits_pad[:, :action_space], ref_b, atol=1e-4, rtol=1e-4)
    assert jnp.allclose(logits_pad[:, action_space:], 0.0)

    # 4) bf16 weights: halved weight DMA/VMEM, f32 MXU accumulation.
    w1h, b1h, w2h, b2h = init_policy_params(
        kp, input_dimension, action_space, param_dtype=jnp.bfloat16)
    logits_bf = jax.block_until_ready(
        policy_forward(xb, w1h, b1h, w2h, b2h, action_space=action_space))
    ref_bf = _ref_forward(xb, w1h, b1h, w2h, b2h)[:, :action_space]
    assert jnp.allclose(logits_bf, ref_bf, atol=2e-2, rtol=2e-2)

    print("KERNEL_OK")
</pallas_src>

<mosaic_0001>
module attributes {stable_mosaic.version = 11 : i64} {
  func.func @_policy_kernel(%arg0: memref<8x32xf32, #tpu.memory_space<vmem>>, %arg1: memref<32x512xf32, #tpu.memory_space<vmem>>, %arg2: memref<1x512xf32, #tpu.memory_space<vmem>>, %arg3: memref<512x128xf32, #tpu.memory_space<vmem>>, %arg4: memref<1x128xf32, #tpu.memory_space<vmem>>, %arg5: memref<8x128xf32, #tpu.memory_space<vmem>>) attributes {dimension_semantics = [], scalar_prefetch = 0 : i64, scratch_operands = 0 : i64, tpu.core_type = #tpu.core_type<tc>} {
    %c0 = arith.constant 0 : index
    %c0_0 = arith.constant 0 : index
    %0 = vector.load %arg0[%c0, %c0_0] : memref<8x32xf32, #tpu.memory_space<vmem>>, vector<8x32xf32>
    %c0_1 = arith.constant 0 : index
    %c0_2 = arith.constant 0 : index
    %1 = vector.load %arg1[%c0_1, %c0_2] : memref<32x512xf32, #tpu.memory_space<vmem>>, vector<32x512xf32>
    %cst = arith.constant dense<0.000000e+00> : vector<8x512xf32>
    %2 = tpu.matmul %0, %1, %cst {dimension_numbers = #tpu.dot_dimension_numbers<[1], [0], [0], [1], [0, 0, 1, 1], [], []>} : vector<8x32xf32>, vector<32x512xf32>, vector<8x512xf32> -> vector<8x512xf32>
    %c0_3 = arith.constant 0 : index
    %c0_4 = arith.constant 0 : index
    %3 = vector.load %arg2[%c0_3, %c0_4] : memref<1x512xf32, #tpu.memory_space<vmem>>, vector<1x512xf32>
    %4 = vector.broadcast %3 : vector<1x512xf32> to vector<8x512xf32>
    %5 = arith.addf %2, %4 : vector<8x512xf32>
    %cst_5 = arith.constant 0.000000e+00 : f32
    %6 = vector.broadcast %cst_5 : f32 to vector<8x512xf32>
    %7 = arith.maximumf %5, %6 : vector<8x512xf32>
    %c0_6 = arith.constant 0 : index
    %c0_7 = arith.constant 0 : index
    %8 = vector.load %arg3[%c0_6, %c0_7] : memref<512x128xf32, #tpu.memory_space<vmem>>, vector<512x128xf32>
    %cst_8 = arith.constant dense<0.000000e+00> : vector<8x128xf32>
    %9 = tpu.matmul %7, %8, %cst_8 {dimension_numbers = #tpu.dot_dimension_numbers<[1], [0], [0], [1], [0, 0, 1, 1], [], []>} : vector<8x512xf32>, vector<512x128xf32>, vector<8x128xf32> -> vector<8x128xf32>
    %c0_9 = arith.constant 0 : index
    %c0_10 = arith.constant 0 : index
    %10 = vector.load %arg4[%c0_9, %c0_10] : memref<1x128xf32, #tpu.memory_space<vmem>>, vector<1x128xf32>
    %11 = vector.broadcast %10 : vector<1x128xf32> to vector<8x128xf32>
    %12 = arith.addf %9, %11 : vector<8x128xf32>
    %c0_11 = arith.constant 0 : index
    %c0_12 = arith.constant 0 : index
    %13 = vector.load %arg5[%c0_11, %c0_12] : memref<8x128xf32, #tpu.memory_space<vmem>>, vector<8x128xf32>
    tpu.vector_store %arg5[%c0_11, %c0_12], %12 {strides = array<i32>} : memref<8x128xf32, #tpu.memory_space<vmem>>, vector<8x128xf32>,
    return
  }
}

</mosaic_0001>

<bundles_post_ra>
// kernel: tpu_custom_call.1
= control target key start
LH: loop header
LB: loop body
LE: loop exit
PB: predicated region body
PF: predicated region fallthrough
CT: control target
= control target key end

     0   :  { %10 = vsyncpa [#allocation3], 0  ;;  %s828_s0 = inlined_call_operand.hbm [shape: f32[8,32], index: 0, kind: input, shape index: {}]   ;;  %s829_s1 = inlined_call_operand.hbm [shape: f32[32,512], index: 1, kind: input, shape index: {}]   ;;  %s830_s2 = inlined_call_operand.vmem [shape: f32[1,512], index: 2, kind: input, shape index: {}]   ;;  %s831_s3 = inlined_call_operand.hbm [shape: f32[512,128], index: 3, kind: input, shape index: {}]   ;;  %s832_s4 = inlined_call_operand.vmem [shape: f32[1,128], index: 4, kind: input, shape index: {}]   ;;  %s833_s5 = inlined_call_operand.hbm [shape: f32[8,128], index: 5, kind: output, shape index: {}]  }
   0x1   :  { %11 = vsyncpa [#allocation6], 0 }
   0x2   :  { %12 = vsyncpa [#allocation4], 0  ;;  %s733_s18 = smov [#allocation5]   ;;  %s639_s22 = scalar_lea.hbm %s829_s1, 2048 }
   0x3   :  { %s28_s19 = sshll.u32 %s733_s18, 4  ;;  %p640_p0 = scmp.ne.s32.totalorder %s829_s1, %s639_s22  ;;  %s29_s19 = int_to_ptr.vmem [resolvable:$true] %s28_s19 }
   0x4   :  { %p643_p1 = scmp.lt.u32.totalorder %s639_s22, %s829_s1 }
   0x6   :  { %p645_p2 = pnand %p643_p1, %p640_p0 }
   0x8   :  { %648 = shalt.err (!%p645_p2)
}
   0x9   :  { %s649_s27 = scalar_lea.vmem %s29_s19, 2048  ;;  %p654_p4 = scmp.lt.s32.totalorder %s29_s19, %s29_s19 }
   0xa   :  { %p650_p3 = scmp.ne.s32.totalorder %s29_s19, %s649_s27  ;;  %p655_p5 = scmp.lt.s32.totalorder %s649_s27, %s649_s27 }
   0xc   :  { %p656_p6 = por %p655_p5, %p654_p4 }
   0xe   :  { %p657_p7 = pnand %p656_p6, %p650_p3 }
  0x10   :  { %660 = shalt.err (!%p657_p7)
}
  0x11   :  { %s734_s28 = smov 512   ;;  %s735_s29 = smov 32  }
  0x12   :  { %34 = dma.hbm_to_vmem [thread:$0]  %s829_s1, 2048, %s29_s19, [#allocation6], %s734_s28, %s734_s28, %s735_s29  }
  0x13   :  { %s736_s7 = smov [#allocation2]   ;;  %s737_s9 = smov [#allocation7]  }
  0x14   :  { %s19_s8 = sshll.u32 %s736_s7, 4  ;;  %s42_s10 = sshll.u32 %s737_s9, 4  ;;  %s20_s8 = int_to_ptr.vmem [resolvable:$true] %s19_s8  ;;  %s43_s10 = int_to_ptr.vmem [resolvable:$true] %s42_s10 }
  0x15   :  { %s661_s13 = scalar_lea.hbm %s828_s0, 128 }
  0x16   :  { %p662_p8 = scmp.ne.s32.totalorder %s828_s0, %s661_s13  ;;  %p665_p9 = scmp.lt.u32.totalorder %s661_s13, %s828_s0 }
  0x18   :  { %p667_p10 = pnand %p665_p9, %p662_p8 }
  0x1a   :  { %670 = shalt.err (!%p667_p10)
}
  0x1b   :  { %s671_s1 = scalar_lea.vmem %s20_s8, 128  ;;  %p676_p12 = scmp.lt.s32.totalorder %s20_s8, %s20_s8 }
  0x1c   :  { %p672_p11 = scmp.ne.s32.totalorder %s20_s8, %s671_s1  ;;  %p677_p13 = scmp.lt.s32.totalorder %s671_s1, %s671_s1 }
  0x1e   :  { %p678_p0 = por %p677_p13, %p676_p12 }
  0x20   :  { %p679_p1 = pnand %p678_p0, %p672_p11 }
  0x22   :  { %682 = shalt.err (!%p679_p1)
}
  0x23   :  { %22 = dma.hbm_to_vmem [thread:$0]  %s828_s0, 128, %s20_s8, [#allocation3]  }
  0x24   :  { %s683_s22 = scalar_lea.hbm %s831_s3, 8192 }
  0x25   :  { %p684_p2 = scmp.ne.s32.totalorder %s831_s3, %s683_s22  ;;  %p687_p3 = scmp.lt.u32.totalorder %s683_s22, %s831_s3 }
  0x27   :  { %p689_p4 = pnand %p687_p3, %p684_p2 }
  0x29   :  { %692 = shalt.err (!%p689_p4)
}
  0x2a   :  { %s693_s27 = scalar_lea.vmem %s43_s10, 8192  ;;  %p698_p6 = scmp.lt.s32.totalorder %s43_s10, %s43_s10 }
  0x2b   :  { %p694_p5 = scmp.ne.s32.totalorder %s43_s10, %s693_s27  ;;  %p699_p7 = scmp.lt.s32.totalorder %s693_s27, %s693_s27 }
  0x2d   :  { %p700_p8 = por %p699_p7, %p698_p6 }
  0x2f   :  { %p701_p9 = pnand %p700_p8, %p694_p5 }
  0x31   :  { %704 = shalt.err (!%p701_p9)
}
  0x32   :  { %s738_s0 = smov 128   ;;  %s739_s28 = smov 8  }
  0x33   :  { %48 = dma.hbm_to_vmem [thread:$0]  %s831_s3, 8192, %s43_s10, [#allocation6], %s738_s0, %s738_s0, %s739_s28  }
  0x34   :  { %727 = dma.done.wait [#allocation3], 128  }
  0x35   :  { %728 = vsyncadd [#allocation3], 4294967168 }
  0x36   :  { %729 = dma.done.wait [#allocation6], 10240  }
  0x37   :  { %730 = vsyncadd [#allocation6], 4294957056  ;;  %v740_v0 = vmov 0.0   ;;  %v62_v1 = vld [vmem:[#allocation5 + $0x8] sm:$0xff]  ;;  %v64_v3 = vld [vmem:[#allocation5 + $0x18] sm:$0xff]  ;;  %vm99_vm0 = vcmask 261120  }
  0x38   :  { %167 = vmatprep.mubr.f32.mxu0 %v740_v0  ;;  %238 = vmatprep.mubr.f32.mxu1 %v740_v0  ;;  %v66_v2 = vld [vmem:[#allocation5 + $0x28] sm:$0xff]  ;;  %v68_v5 = vld [vmem:[#allocation5 + $0x38] sm:$0xff]  ;;  %v61_v6 = vld [vmem:[#allocation5] sm:$0xff]  ;;  %s741_s8 = smov [#allocation8]  }
  0x39   :  { %v550_v4 = vpack.c.bf16 %v66_v2, %v62_v1  ;;  %v65_v7 = vld [vmem:[#allocation5 + $0x20] sm:$0xff]  ;;  %v558_v8 = vpack.c.bf16 %v68_v5, %v64_v3  ;;  %v63_v10 = vld [vmem:[#allocation5 + $0x10] sm:$0xff]  ;;  %v70_v12 = vld [vmem:[#allocation5 + $0x48] sm:$0xff]  ;;  %s467_s9 = sshll.u32 %s741_s8, 4  ;;  %s468_s9 = int_to_ptr.vmem [resolvable:$true] %s467_s9 }
  0x3a   :  { %v552_v9 = vpack.c.bf16 %v65_v7, %v61_v6  ;;  %v67_v11 = vld [vmem:[#allocation5 + $0x30] sm:$0xff]  ;;  %v74_v14 = vld [vmem:[#allocation5 + $0x68] sm:$0xff]  ;;  %v72_v15 = vld [vmem:[#allocation5 + $0x58] sm:$0xff]  ;;  %s705_s10 = scalar_lea.vmem %s468_s9, 128  ;;  %p710_p11 = scmp.lt.s32.totalorder %s468_s9, %s468_s9 }
  0x3b   :  { %551 = vmatprep.subr.bf16.mxu0 %v550_v4  ;;  %v560_v13 = vpack.c.bf16 %v67_v11, %v63_v10  ;;  %v76_v16 = vld [vmem:[#allocation5 + $0x78] sm:$0xff]  ;;  %559 = vmatprep.subr.bf16.mxu1 %v558_v8  ;;  %v554_v17 = vpack.c.bf16 %v74_v14, %v70_v12  ;;  %v69_v19 = vld [vmem:[#allocation5 + $0x40] sm:$0xff]  ;;  %v71_v21 = vld [vmem:[#allocation5 + $0x50] sm:$0xff]  ;;  %p706_p10 = scmp.ne.s32.totalorder %s468_s9, %s705_s10  ;;  %p711_p12 = scmp.lt.s32.totalorder %s705_s10, %s705_s10 }
  0x3c   :  { %553 = vmatpush1.bf16.msra.mxu0 %v552_v9  ;;  %v562_v18 = vpack.c.bf16 %v76_v16, %v72_v15  ;;  %v73_v20 = vld [vmem:[#allocation5 + $0x60] sm:$0xff]  ;;  %v75_v23 = vld [vmem:[#allocation5 + $0x70] sm:$0xff]  ;;  %v60_v26 = vld [vmem:[#allocation2] sm:$0xff] }
  0x3d   :  { %561 = vmatpush1.bf16.msra.mxu1 %v560_v13  ;;  %v556_v22 = vpack.c.bf16 %v73_v20, %v69_v19  ;;  %v265_v24 = vld [vmem:[#allocation7 + $0x80] sm:$0xff]  ;;  %555 = vmatprep.subr.bf16.mxu0 %v554_v17  ;;  %v564_v25 = vpack.c.bf16 %v75_v23, %v71_v21  ;;  %v266_v27 = vld [vmem:[#allocation7 + $0x88] sm:$0xff]  ;;  %v267_v37 = vld [vmem:[#allocation7 + $0x90] sm:$0xff]  ;;  %p712_p13 = por %p711_p12, %p710_p11 }
  0x3e   :  { %563 = vmatprep.subr.bf16.mxu1 %v562_v18  ;;  %v297_v28 = vld [vmem:[#allocation7 + $0x180] sm:$0xff]  ;;  %v298_v29 = vld [vmem:[#allocation7 + $0x188] sm:$0xff]  ;;  %v566_v30 = vpack.c.bf16 %v266_v27, %v265_v24  ;;  %v268_v38 = vld [vmem:[#allocation7 + $0x98] sm:$0xff] }
  0x3f   :  { %v598_v31 = vpack.c.bf16 %v298_v29, %v297_v28  ;;  %v249_v32 = vld [vmem:[#allocation7] sm:$0xff]  ;;  %v250_v33 = vld [vmem:[#allocation7 + $0x8] sm:$0xff]  ;;  %v570_v40 = vpack.c.bf16 %v268_v38, %v267_v37  ;;  %v299_v41 = vld [vmem:[#allocation7 + $0x190] sm:$0xff]  ;;  %p713_p0 = pnand %p712_p13, %p706_p10 }
  0x40   :  { %v281_v34 = vld [vmem:[#allocation7 + $0x100] sm:$0xff]  ;;  %557 = vmatpush1.bf16.msra.mxu0 %v556_v22  ;;  %v568_v35 = vpack.c.bf16 %v250_v33, %v249_v32  ;;  %v282_v36 = vld [vmem:[#allocation7 + $0x108] sm:$0xff]  ;;  %v300_v42 = vld [vmem:[#allocation7 + $0x198] sm:$0xff] }
  0x41   :  { %565 = vmatpush1.bf16.msra.mxu1 %v564_v25  ;;  %567 = vmatprep.subr.bf16.mxu0 %v566_v30  ;;  %v600_v39 = vpack.c.bf16 %v282_v36, %v281_v34  ;;  %v251_v43 = vld [vmem:[#allocation7 + $0x10] sm:$0xff]  ;;  %v602_v44 = vpack.c.bf16 %v300_v42, %v299_v41  ;;  %v252_v45 = vld [vmem:[#allocation7 + $0x18] sm:$0xff]  ;;  %v269_v48 = vld [vmem:[#allocation7 + $0xa0] sm:$0xff] }
  0x42   :  { %599 = vmatprep.subr.bf16.mxu1 %v598_v31  ;;  %v283_v46 = vld [vmem:[#allocation7 + $0x110] sm:$0xff]  ;;  %v284_v47 = vld [vmem:[#allocation7 + $0x118] sm:$0xff]  ;;  %v270_v49 = vld [vmem:[#allocation7 + $0xa8] sm:$0xff]  ;;  %v572_v51 = vpack.c.bf16 %v252_v45, %v251_v43 }
  0x43   :  { %477 = vmatmul.mubr.msk.f32.vlgmr.msra.gmra.mrb[0].mxu0 %vm99_vm0, %v60_v26  ;;  %v301_v50 = vld [vmem:[#allocation7 + $0x1a0] sm:$0xff]  ;;  %v302_v52 = vld [vmem:[#allocation7 + $0x1a8] sm:$0xff]  ;;  %v604_v53 = vpack.c.bf16 %v284_v47, %v283_v46  ;;  %v574_v54 = vpack.c.bf16 %v270_v49, %v269_v48  ;;  %v271_v60 = vld [vmem:[#allocation7 + $0xb0] sm:$0xff] }
  0x44   :  { %478 = vmatmul.mubr.msk.f32.vlgmr.msra.gmra.mrb[0].mxu1 %vm99_vm0, %v60_v26  ;;  %569 = vmatpush3.bf16.msra.mxu0 %v568_v35  ;;  %v253_v55 = vld [vmem:[#allocation7 + $0x20] sm:$0xff]  ;;  %v254_v56 = vld [vmem:[#allocation7 + $0x28] sm:$0xff]  ;;  %v606_v58 = vpack.c.bf16 %v302_v52, %v301_v50  ;;  %v272_v61 = vld [vmem:[#allocation7 + $0xb8] sm:$0xff] }
  0x45   :  { %601 = vmatpush3.bf16.msra.mxu1 %v600_v39  ;;  %571 = vmatprep.subr.bf16.mxu0 %v570_v40  ;;  %v285_v57 = vld [vmem:[#allocation7 + $0x120] sm:$0xff]  ;;  %v286_v59 = vld [vmem:[#allocation7 + $0x128] sm:$0xff]  ;;  %v303_v62 = vld [vmem:[#allocation7 + $0x1b0] sm:$0xff]  ;;  %v576_v0 = vpack.c.bf16 %v254_v56, %v253_v55  ;;  %v578_v2 = vpack.c.bf16 %v272_v61, %v271_v60 }
  0x46   :  { %603 = vmatprep.subr.bf16.mxu1 %v602_v44  ;;  %v304_v63 = vld [vmem:[#allocation7 + $0x1b8] sm:$0xff]  ;;  %v608_v1 = vpack.c.bf16 %v286_v59, %v285_v57  ;;  %v255_v3 = vld [vmem:[#allocation7 + $0x30] sm:$0xff]  ;;  %v273_v8 = vld [vmem:[#allocation7 + $0xc0] sm:$0xff] }
  0x47   :  { %v256_v4 = vld [vmem:[#allocation7 + $0x38] sm:$0xff]  ;;  %v287_v5 = vld [vmem:[#allocation7 + $0x130] sm:$0xff]  ;;  %v610_v6 = vpack.c.bf16 %v304_v63, %v303_v62  ;;  %v274_v9 = vld [vmem:[#allocation7 + $0xc8] sm:$0xff] }
  0x48   :  { %573 = vmatpush3.bf16.msra.mxu0 %v572_v51  ;;  %v288_v7 = vld [vmem:[#allocation7 + $0x138] sm:$0xff]  ;;  %v305_v10 = vld [vmem:[#allocation7 + $0x1c0] sm:$0xff]  ;;  %v306_v11 = vld [vmem:[#allocation7 + $0x1c8] sm:$0xff]  ;;  %v580_v12 = vpack.c.bf16 %v256_v4, %v255_v3  ;;  %v582_v14 = vpack.c.bf16 %v274_v9, %v273_v8 }
  0x49   :  { %605 = vmatpush3.bf16.msra.mxu1 %v604_v53  ;;  %575 = vmatprep.subr.bf16.mxu0 %v574_v54  ;;  %v612_v13 = vpack.c.bf16 %v288_v7, %v287_v5  ;;  %v257_v15 = vld [vmem:[#allocation7 + $0x40] sm:$0xff]  ;;  %v258_v16 = vld [vmem:[#allocation7 + $0x48] sm:$0xff]  ;;  %v614_v18 = vpack.c.bf16 %v306_v11, %v305_v10  ;;  %v275_v20 = vld [vmem:[#allocation7 + $0xd0] sm:$0xff] }
  0x4a   :  { %607 = vmatprep.subr.bf16.mxu1 %v606_v58  ;;  %v289_v17 = vld [vmem:[#allocation7 + $0x140] sm:$0xff]  ;;  %v290_v19 = vld [vmem:[#allocation7 + $0x148] sm:$0xff]  ;;  %v276_v21 = vld [vmem:[#allocation7 + $0xd8] sm:$0xff]  ;;  %v584_v24 = vpack.c.bf16 %v258_v16, %v257_v15  ;;  %v79_v58 = vlaneseq }
  0x4b   :  { %v307_v22 = vld [vmem:[#allocation7 + $0x1d0] sm:$0xff]  ;;  %v308_v23 = vld [vmem:[#allocation7 + $0x1d8] sm:$0xff]  ;;  %v616_v25 = vpack.c.bf16 %v290_v19, %v289_v17  ;;  %v586_v26 = vpack.c.bf16 %v276_v21, %v275_v20  ;;  %v277_v32 = vld [vmem:[#allocation7 + $0xe0] sm:$0xff] }
  0x4c   :  { %577 = vmatpush3.bf16.msra.mxu0 %v576_v0  ;;  %v259_v27 = vld [vmem:[#allocation7 + $0x50] sm:$0xff]  ;;  %v260_v28 = vld [vmem:[#allocation7 + $0x58] sm:$0xff]  ;;  %v618_v30 = vpack.c.bf16 %v308_v23, %v307_v22  ;;  %v278_v33 = vld [vmem:[#allocation7 + $0xe8] sm:$0xff]  ;;  %v80_v59 = vshrl.u32 %v79_v58, 7 }
  0x4d   :  { %609 = vmatpush3.bf16.msra.mxu1 %v608_v1  ;;  %579 = vmatprep.subr.bf16.mxu0 %v578_v2  ;;  %v291_v29 = vld [vmem:[#allocation7 + $0x150] sm:$0xff]  ;;  %v292_v31 = vld [vmem:[#allocation7 + $0x158] sm:$0xff]  ;;  %v309_v34 = vld [vmem:[#allocation7 + $0x1e0] sm:$0xff]  ;;  %v588_v36 = vpack.c.bf16 %v260_v28, %v259_v27  ;;  %v590_v38 = vpack.c.bf16 %v278_v33, %v277_v32 }
  0x4e   :  { %611 = vmatprep.subr.bf16.mxu1 %v610_v6  ;;  %v310_v35 = vld [vmem:[#allocation7 + $0x1e8] sm:$0xff]  ;;  %v620_v37 = vpack.c.bf16 %v292_v31, %v291_v29  ;;  %v261_v40 = vld [vmem:[#allocation7 + $0x60] sm:$0xff]  ;;  %v279_v46 = vld [vmem:[#allocation7 + $0xf0] sm:$0xff]  ;;  %v81_v60 = vsub.s32 0, %v80_v59  ;;  %v89_v62 = vsub.s32 2, %v80_v59  ;;  %v85_v63 = vsub.s32 1, %v80_v59 }
  0x4f   :  { %v622_v39 = vpack.c.bf16 %v310_v35, %v309_v34  ;;  %v262_v41 = vld [vmem:[#allocation7 + $0x68] sm:$0xff]  ;;  %v293_v42 = vld [vmem:[#allocation7 + $0x160] sm:$0xff]  ;;  %v280_v47 = vld [vmem:[#allocation7 + $0xf8] sm:$0xff]  ;;  %v93_v0 = vsub.s32 3, %v80_v59 }
  0x50   :  { %581 = vmatpush3.bf16.msra.mxu0 %v580_v12  ;;  %v592_v43 = vpack.c.bf16 %v262_v41, %v261_v40  ;;  %v294_v44 = vld [vmem:[#allocation7 + $0x168] sm:$0xff]  ;;  %v311_v48 = vld [vmem:[#allocation7 + $0x1f0] sm:$0xff]  ;;  %v594_v49 = vpack.c.bf16 %v280_v47, %v279_v46  ;;  %v312_v50 = vld [vmem:[#allocation7 + $0x1f8] sm:$0xff] }
  0x51   :  { %613 = vmatpush3.bf16.msra.mxu1 %v612_v13  ;;  %583 = vmatprep.subr.bf16.mxu0 %v582_v14  ;;  %v624_v45 = vpack.c.bf16 %v294_v44, %v293_v42  ;;  %v263_v51 = vld [vmem:[#allocation7 + $0x70] sm:$0xff]  ;;  %v264_v52 = vld [vmem:[#allocation7 + $0x78] sm:$0xff]  ;;  %v626_v53 = vpack.c.bf16 %v312_v50, %v311_v48 }
  0x52   :  { %615 = vmatprep.subr.bf16.mxu1 %v614_v18  ;;  %v596_v54 = vpack.c.bf16 %v264_v52, %v263_v51  ;;  %v295_v55 = vld [vmem:[#allocation7 + $0x170] sm:$0xff]  ;;  %v296_v56 = vld [vmem:[#allocation7 + $0x178] sm:$0xff] }
  0x53   :  { %v628_v57 = vpack.c.bf16 %v296_v56, %v295_v55  ;;  %v77_v61 = vld [vmem:[%s830_s2] sm:$0xf] }
  0x54   :  { %585 = vmatpush3.bf16.msra.mxu0 %v584_v24  ;;  %v82_v1 = vrot.slane %v77_v61, %v81_v60  ;;  %v90_v2 = vrot.slane %v77_v61, %v89_v62  ;;  %v86_v3 = vrot.slane %v77_v61, %v85_v63  ;;  %v94_v4 = vrot.slane %v77_v61, %v93_v0  ;;  %v479_v19 = vld [vmem:[%s832_s4] ss:$0 sm:$0xff] }
  0x55   :  { %617 = vmatpush3.bf16.msra.mxu1 %v616_v25  ;;  %587 = vmatprep.subr.bf16.mxu0 %v586_v26 }
  0x56   :  { %619 = vmatprep.subr.bf16.mxu1 %v618_v30 }
  0x58   :  { %589 = vmatpush3.bf16.msra.mxu0 %v588_v36 }
  0x59   :  { %621 = vmatpush3.bf16.msra.mxu1 %v620_v37  ;;  %591 = vmatprep.subr.bf16.mxu0 %v590_v38 }
  0x5a   :  { %623 = vmatprep.subr.bf16.mxu1 %v622_v39 }
  0x5c   :  { %593 = vmatpush3.bf16.msra.mxu0 %v592_v43 }
  0x5d   :  { %625 = vmatpush3.bf16.msra.mxu1 %v624_v45  ;;  %595 = vmatprep.subr.bf16.mxu0 %v594_v49 }
  0x5e   :  { %627 = vmatprep.subr.bf16.mxu1 %v626_v53 }
  0x60   :  { %597 = vmatpush3.bf16.msra.mxu0 %v596_v54 }
  0x61   :  { %629 = vmatpush3.bf16.msra.mxu1 %v628_v57 }
 0x116   :  { %v169_v5 = vpop.f32.mrb[0].mxu0 }
 0x117   :  { %v170_v6 = vadd.f32 %v169_v5, %v82_v1  ;;  %v240_v7 = vpop.f32.mrb[0].mxu1  ;;  %v171_v8 = vpop.f32.mrb[1].mxu0 }
 0x118   :  { %v241_v9 = vadd.f32 %v240_v7, %v90_v2  ;;  %v172_v10 = vadd.f32 %v171_v8, %v86_v3  ;;  %v242_v11 = vpop.f32.mrb[1].mxu1 }
 0x119   :  { %v243_v12 = vadd.f32 %v242_v11, %v94_v4  ;;  %v245_v15 = vmax.f32 %v170_v6, 0.0 }
 0x11a   :  { %v247_v13 = vmax.f32 %v241_v9, 0.0  ;;  %v246_v14 = vmax.f32 %v172_v10, 0.0 }
 0x11b   :  { %v248_v16 = vmax.f32 %v243_v12, 0.0 }
 0x11c   :  { %384 = vmatprep.mubr.f32.mxu0 %v246_v14 }
 0x11d   :  { %454 = vmatprep.mubr.f32.mxu1 %v248_v16  ;;  %385 = vmatmul.mubr.f32.vlgmr.msra.gmra.mrb[2].mxu0 %v245_v15 }
 0x11e   :  { %455 = vmatmul.mubr.f32.vlgmr.msra.gmra.mrb[2].mxu1 %v247_v13 }
 0x1f0   :  { %v512_v17 = vpop.f32.mrb[2].mxu0 }
 0x1f1   :  { %v547_v18 = vpop.f32.mrb[2].mxu1  ;;  %v513_v20 = vpop.f32.mrb[3].mxu0 }
 0x1f2   :  { %v514_v21 = vadd.f32 %v513_v20, %v512_v17  ;;  %v548_v22 = vpop.f32.mrb[3].mxu1 }
 0x1f3   :  { %v549_v23 = vadd.f32 %v548_v22, %v547_v18 }
 0x1f4   :  { %v387_v24 = vadd.f32 %v514_v21, %v479_v19 }
 0x1f6   :  { %v457_v25 = vadd.f32 %v549_v23, %v387_v24 }
 0x1f8   :  { %460 = vst [vmem:[#allocation8] sm:$0xff] %v457_v25 }
 0x1f9   :  { %716 = shalt.err (!%p713_p0)
}
 0x1fa   :  { %s717_s4 = scalar_lea.hbm %s833_s5, 128 }
 0x1fb   :  { %p718_p1 = scmp.ne.s32.totalorder %s833_s5, %s717_s4  ;;  %p721_p2 = scmp.lt.u32.totalorder %s717_s4, %s833_s5 }
 0x1fd   :  { %p723_p3 = pnand %p721_p2, %p718_p1 }
 0x1ff   :  { %726 = shalt.err (!%p723_p3)
}
 0x200   :  { %470 = dma.vmem_to_hbm [thread:$0]  %s468_s9, 128, %s833_s5, [#allocation4]  }
 0x201   :  { %731 = dma.done.wait [#allocation4], 128  }
 0x202   :  { %732 = vsyncadd [#allocation4], 4294967168 }
 0x203   :  { %474 = vsyncpa [#allocation3], 1 }
 0x204   :  { %475 = vsyncpa [#allocation6], 1 }
 0x205   :  { %476 = vsyncpa [#allocation4], 1 }

</bundles_post_ra>
